<compile_context>
chip_gen: v6e
topology: v6e:2x2x1
jax: 0.10.0
libtpu: 0.0.40
codegen_flags: <defaults>
</compile_context>

<pallas_src>
import jax
import jax.numpy as jnp
from jax import lax
from jax.experimental import pallas as pl
from jax.experimental.pallas import tpu as pltpu

LRELU_SLOPE = 0.1


def _get_padding(kernel_size, dilation):
    return (kernel_size * dilation - dilation) // 2


# ---------------------------------------------------------------------------
# pltpu.roll direction probe (one tiny kernel, run once, outside any trace of
# the main kernel).  Makes the cyclic-window shifts robust to either rotate
# convention.
# ---------------------------------------------------------------------------
_ROLL_MATCHES_JNP = None


def _roll_matches_jnp():
    """True if pltpu.roll(x, s)[j] == x[(j - s) % n]  (jnp.roll convention)."""
    global _ROLL_MATCHES_JNP
    if _ROLL_MATCHES_JNP is None:
        def probe(x_ref, o_ref):
            o_ref[...] = pltpu.roll(x_ref[...], shift=1, axis=1)

        x = lax.broadcasted_iota(jnp.float32, (8, 128), 1)
        out = pl.pallas_call(
            probe, out_shape=jax.ShapeDtypeStruct((8, 128), jnp.float32))(x)
        val = float(jax.device_get(out)[0, 0])
        if val == 127.0:
            _ROLL_MATCHES_JNP = True
        elif val == 1.0:
            _ROLL_MATCHES_JNP = False
        else:
            raise RuntimeError("unexpected pltpu.roll semantics")
    return _ROLL_MATCHES_JNP


def _cyclic_window(a, start, width, matches_jnp):
    """result[:, j] = a[:, (j + start) % width]  (lane-axis cyclic shift)."""
    s = start % width
    if s == 0:
        return a
    shift = (width - s) if matches_jnp else s
    return pltpu.roll(a, shift=shift, axis=1)


# ---------------------------------------------------------------------------
# VMEM sizing helpers
# ---------------------------------------------------------------------------
def _vmem_capacity_bytes():
    try:
        return int(pltpu.get_tpu_info().vmem_capacity_bytes)
    except Exception:
        return 64 << 20          # v7x per-TensorCore budget (most restrictive)


def _vmem_bytes_estimate(C, K, tile_t, in_bytes, mxu_bytes):
    """Rough per-call VMEM footprint (double-buffered I/O + weights + scratch)."""
    W1p = tile_t + 128
    io = 2 * 2 * C * tile_t * in_bytes                 # x tile + out tile
    halo = 2 * C * 128 * in_bytes                      # lane-padded halo block
    weights = 2 * 2 * C * K * C * mxu_bytes            # w1f + w2f (2-buffered)
    biases = 2 * 2 * C * 128 * 4                       # lane-padded (C,1) biases
    scratch = C * W1p * 4 + K * C * W1p * mxu_bytes    # act window + tap stack
    return io + halo + weights + biases + scratch


def _default_tile_t(T, C, K, in_bytes, mxu_bytes, budget):
    """Largest lane-aligned tile within the VMEM budget; prefer a divisor of T."""
    if T <= 1024 and _vmem_bytes_estimate(C, K, T, in_bytes, mxu_bytes) <= budget:
        return T                                       # single tile
    cap = max(128, min(2048, (T // 128) * 128))
    fit, t = 128, 256
    while t <= cap and _vmem_bytes_estimate(C, K, t, in_bytes, mxu_bytes) <= budget:
        fit, t = t, t + 128
    for cand in range(fit, 127, -128):                 # avoid wrapper pad/slice
        if T % cand == 0:
            return cand
    return fit


# ---------------------------------------------------------------------------
# Fused ResBlock2 forward
# ---------------------------------------------------------------------------
def resblock2_forward(x, params, dilations=(1, 3), tile_t=None,
                      mxu_dtype=jnp.bfloat16, vmem_budget_bytes=None):
    """x -> x + c1(lrelu(x)) -> . + c2(lrelu(.)) in one Pallas kernel.

    x      : (B, C, T) float32
    params : [(w1, b1), (w2, b2)];  w: (K, C_out, C_in), b: (C, 1)
    """
    assert len(params) == 2 and len(dilations) == 2
    B, C, T = x.shape
    (w1, b1), (w2, b2) = params
    K = w1.shape[0]
    d1, d2 = dilations
    pad1 = _get_padding(K, d1)
    pad2 = _get_padding(K, d2)
    H = pad1 + pad2                      # halo per side (4 for K=3, dil (1,3))
    assert 2 * H <= 128, "halo must fit inside one 128-lane granule"

    matches_jnp = _roll_matches_jnp()    # resolve roll direction before tracing

    in_bytes = jnp.dtype(x.dtype).itemsize
    mxu_bytes = jnp.dtype(mxu_dtype).itemsize
    cap = _vmem_capacity_bytes()
    if vmem_budget_bytes is None:
        vmem_budget_bytes = min(48 << 20, int(cap * 0.6))

    # ---- time tiling -------------------------------------------------------
    if tile_t is None:
        tile_t = _default_tile_t(T, C, K, in_bytes, mxu_bytes, vmem_budget_bytes)
    tile_t = min(tile_t, T)
    if tile_t < T:
        assert tile_t % 128 == 0, "tiled path requires lane-aligned tile_t"
    n_t = (T + tile_t - 1) // tile_t
    Tp = n_t * tile_t
    # Pad only if tile_t does not divide T (default chooser avoids this).
    x_in = x if Tp == T else jnp.pad(x, ((0, 0), (0, 0), (0, Tp - T)))

    # ---- tiny per-tile halo side input (B, n_t, C, 2H), zeros at seq edges --
    xr = x_in.reshape(B, C, n_t, tile_t)
    zed = jnp.zeros((B, C, 1, H), x.dtype)
    lh = jnp.concatenate([zed, xr[:, :, :-1, tile_t - H:]], axis=2)
    rh = jnp.concatenate([xr[:, :, 1:, :H], zed], axis=2)
    xh = jnp.transpose(jnp.concatenate([lh, rh], axis=-1), (0, 2, 1, 3))

    # One (C_out, K*C_in) weight per conv -> single accumulating MXU matmul.
    w1f = jnp.transpose(w1, (1, 0, 2)).reshape(C, K * C).astype(mxu_dtype)
    w2f = jnp.transpose(w2, (1, 0, 2)).reshape(C, K * C).astype(mxu_dtype)
    b1c = b1.astype(jnp.float32)
    b2c = b2.astype(jnp.float32)

    W1p = tile_t + 128                   # 128-padded cyclic window width
    T_true = T
    inv_slope = 1.0 / LRELU_SLOPE

    def kernel(x_ref, xh_ref, w1_ref, b1_ref, w2_ref, b2_ref, o_ref, act, stk):
        ti = pl.program_id(1)
        f32 = jnp.float32

        # -- leaky_relu(x) into the cyclic window scratch (aligned big store) --
        xt = x_ref[0].astype(f32)
        act[:, 0:tile_t] = jnp.maximum(xt, LRELU_SLOPE * xt)
        hal = xh_ref[0, 0].astype(f32)
        hal = jnp.maximum(hal, LRELU_SLOPE * hal)
        act[:, tile_t:tile_t + H] = hal[:, H:2 * H]        # right halo
        act[:, W1p - H:W1p] = hal[:, 0:H]                  # left halo (wrapped)

        a1 = act[...]

        # -- conv1: pack K dilated taps (im2col) and do ONE matmul -------------
        r1 = None
        for k in range(K):
            start = k * d1 - H
            w = _cyclic_window(a1, start, W1p, matches_jnp)
            if start == -pad2:            # tap window == residual-x window
                r1 = w
            stk[k * C:(k + 1) * C, :] = w.astype(mxu_dtype)
        if r1 is None:
            r1 = _cyclic_window(a1, -pad2, W1p, matches_jnp)
        resid1 = jnp.minimum(r1, r1 * inv_slope)           # recover raw x (f32)

        y1 = jnp.dot(w1_ref[...], stk[...], preferred_element_type=f32)
        y1 = y1 + b1_ref[...] + resid1
        # Zero y1 outside the true sequence: realizes conv2's zero padding and
        # kills the padded tile-multiple tail.
        gpos = ti * tile_t - pad2 + lax.broadcasted_iota(jnp.int32, (1, W1p), 1)
        y1 = jnp.where((gpos >= 0) & (gpos < T_true), y1, 0.0)

        # -- conv2: reuse the same scratch buffers -----------------------------
        act[...] = jnp.maximum(y1, LRELU_SLOPE * y1)
        a2 = act[...]
        r2 = None
        for k in range(K):
            start = k * d2
            w = _cyclic_window(a2, start, W1p, matches_jnp)
            if start == pad2:             # tap window == residual-y1 window
                r2 = w
            stk[k * C:(k + 1) * C, 0:tile_t] = w[:, 0:tile_t].astype(mxu_dtype)
        if r2 is None:
            r2 = _cyclic_window(a2, pad2, W1p, matches_jnp)
        r2 = r2[:, 0:tile_t]
        resid2 = jnp.minimum(r2, r2 * inv_slope)           # recover raw y1 (f32)

        y2 = jnp.dot(w2_ref[...], stk[:, 0:tile_t], preferred_element_type=f32)
        o_ref[0] = (y2 + b2_ref[...] + resid2).astype(o_ref.dtype)

    est = _vmem_bytes_estimate(C, K, tile_t, in_bytes, mxu_bytes)
    vmem_limit = int(max(32 << 20, min(int(0.9 * cap), int(1.3 * est) + (8 << 20))))

    out = pl.pallas_call(
        kernel,
        out_shape=jax.ShapeDtypeStruct((B, C, Tp), x.dtype),
        grid_spec=pltpu.PrefetchScalarGridSpec(
            num_scalar_prefetch=0,
            grid=(B, n_t),
            in_specs=[
                pl.BlockSpec((1, C, tile_t), lambda b, t: (b, 0, t)),
                pl.BlockSpec((1, 1, C, 2 * H), lambda b, t: (b, t, 0, 0)),
                # constant index maps: weights / biases are fetched once
                pl.BlockSpec((C, K * C), lambda b, t: (0, 0)),
                pl.BlockSpec((C, 1), lambda b, t: (0, 0)),
                pl.BlockSpec((C, K * C), lambda b, t: (0, 0)),
                pl.BlockSpec((C, 1), lambda b, t: (0, 0)),
            ],
            out_specs=pl.BlockSpec((1, C, tile_t), lambda b, t: (b, 0, t)),
            scratch_shapes=[
                pltpu.VMEM((C, W1p), jnp.float32),      # lrelu window (cyclic)
                pltpu.VMEM((K * C, W1p), mxu_dtype),    # im2col tap stack
            ],
        ),
        compiler_params=pltpu.CompilerParams(
            # Disjoint output tiles along both axes -> shardable across the two
            # v7x TensorCores even at batch 1; harmless on v5e/v6e.
            dimension_semantics=("parallel", "parallel"),
            vmem_limit_bytes=vmem_limit,
        ),
    )(x_in, xh, w1f, b1c, w2f, b2c)

    return out if Tp == T else out[:, :, :T]


# ---------------------------------------------------------------------------
# Pure-JAX reference + init (weight_norm is folded into the effective weight).
# ---------------------------------------------------------------------------
def _reference_forward(x, params, dilations=(1, 3)):
    for (w, b), d in zip(params, dilations):
        xt = jnp.where(x >= 0, x, LRELU_SLOPE * x)
        wk = jnp.transpose(w, (1, 2, 0))               # (K,Co,Ci) -> (Co,Ci,K)
        pad = _get_padding(w.shape[0], d)
        y = lax.conv_general_dilated(
            xt, wk, window_strides=(1,), padding=[(pad, pad)],
            rhs_dilation=(d,), dimension_numbers=("NCH", "OIH", "NCH"))
        x = y + b[None, :, :] + x
    return x


def init_resblock2_params(key, channels, kernel_size=3, n_convs=2):
    """Deterministic init mimicking init_weights (normal, std=0.01)."""
    params = []
    for i in range(n_convs):
        kw, kb = jax.random.split(jax.random.fold_in(key, i))
        w = 0.01 * jax.random.normal(
            kw, (kernel_size, channels, channels), dtype=jnp.float32)
        b = 0.01 * jax.random.normal(kb, (channels, 1), dtype=jnp.float32)
        params.append((w, b))
    return params


if __name__ == "__main__":
    key = jax.random.PRNGKey(0)
    B, C = 2, 8
    kernel_size = 3
    dilations = (1, 3)

    kx, kp = jax.random.split(key)
    params = init_resblock2_params(kp, C, kernel_size)

    # 1) single-tile path, f32 at the MXU (exactness check).
    x1 = jax.random.normal(jax.random.fold_in(kx, 0), (B, C, 256), jnp.float32)
    out1 = jax.block_until_ready(
        resblock2_forward(x1, params, dilations, mxu_dtype=jnp.float32))
    ref1 = jax.block_until_ready(_reference_forward(x1, params, dilations))
    assert out1.shape == x1.shape
    assert jnp.allclose(out1, ref1, atol=5e-4, rtol=5e-4), "f32 single-tile mismatch"

    # 2) tiled path with inter-tile halos (T=384, tile_t=128 -> 3 tiles), f32.
    x2 = jax.random.normal(jax.random.fold_in(kx, 1), (B, C, 384), jnp.float32)
    ref2 = jax.block_until_ready(_reference_forward(x2, params, dilations))
    out2 = jax.block_until_ready(
        resblock2_forward(x2, params, dilations, tile_t=128,
                          mxu_dtype=jnp.float32))
    assert jnp.allclose(out2, ref2, atol=5e-4, rtol=5e-4), "f32 tiled mismatch"

    # 3) ragged tail (T=320 not a multiple of tile_t=128): pad + mask path.
    x3 = jax.random.normal(jax.random.fold_in(kx, 2), (B, C, 320), jnp.float32)
    ref3 = jax.block_until_ready(_reference_forward(x3, params, dilations))
    out3 = jax.block_until_ready(
        resblock2_forward(x3, params, dilations, tile_t=128,
                          mxu_dtype=jnp.float32))
    assert out3.shape == x3.shape
    assert jnp.allclose(out3, ref3, atol=5e-4, rtol=5e-4), "f32 ragged mismatch"

    # 4) default path: bf16 at the MXU (elementwise + residual math stays f32).
    out4 = jax.block_until_ready(
        resblock2_forward(x2, params, dilations, tile_t=128))
    assert jnp.allclose(out4, ref2, atol=3e-2, rtol=3e-2), "bf16 tiled mismatch"

    print("KERNEL_OK")
</pallas_src>

<mosaic_0001>
module attributes {stable_mosaic.version = 11 : i64} {
  func.func @probe(%arg0: memref<8x128xf32, #tpu.memory_space<vmem>>, %arg1: memref<8x128xf32, #tpu.memory_space<vmem>>) attributes {dimension_semantics = [], scalar_prefetch = 0 : i64, scratch_operands = 0 : i64, tpu.core_type = #tpu.core_type<tc>} {
    %c0 = arith.constant 0 : index
    %c0_0 = arith.constant 0 : index
    %0 = vector.load %arg0[%c0, %c0_0] : memref<8x128xf32, #tpu.memory_space<vmem>>, vector<8x128xf32>
    %c1_i32 = arith.constant 1 : i32
    %1 = tpu.dynamic_rotate %0 by %c1_i32 dim 1 : vector<8x128xf32>, i32 -> vector<8x128xf32>
    %c0_1 = arith.constant 0 : index
    %c0_2 = arith.constant 0 : index
    %2 = vector.load %arg1[%c0_1, %c0_2] : memref<8x128xf32, #tpu.memory_space<vmem>>, vector<8x128xf32>
    tpu.vector_store %arg1[%c0_1, %c0_2], %1 {strides = array<i32>} : memref<8x128xf32, #tpu.memory_space<vmem>>, vector<8x128xf32>,
    return
  }
}

</mosaic_0001>

<bundles_post_ra>
// kernel: tpu_custom_call.1
= control target key start
LH: loop header
LB: loop body
LE: loop exit
PB: predicated region body
PF: predicated region fallthrough
CT: control target
= control target key end

     0   :  { %6 = vsyncpa [#allocation3], 0  ;;  %s106_s0 = inlined_call_operand.hbm [shape: f32[8,128], index: 0, kind: input, shape index: {}]   ;;  %s107_s1 = inlined_call_operand.hbm [shape: f32[8,128], index: 1, kind: output, shape index: {}]  }
   0x1   :  { %7 = vsyncpa [#allocation4], 0  ;;  %s87_s6 = smov [#allocation2]  }
   0x2   :  { %s14_s7 = sshll.u32 %s87_s6, 4  ;;  %s15_s7 = int_to_ptr.vmem [resolvable:$true] %s14_s7 }
   0x3   :  { %s51_s8 = scalar_lea.vmem %s15_s7, 128  ;;  %p56_p1 = scmp.lt.s32.totalorder %s15_s7, %s15_s7 }
   0x4   :  { %p52_p0 = scmp.ne.s32.totalorder %s15_s7, %s51_s8  ;;  %p57_p2 = scmp.lt.s32.totalorder %s51_s8, %s51_s8 }
   0x6   :  { %p58_p3 = por %p57_p2, %p56_p1 }
   0x8   :  { %p59_p4 = pnand %p58_p3, %p52_p0 }
   0xa   :  { %62 = shalt.err (!%p59_p4)
}
   0xb   :  { %17 = dma.hbm_to_vmem [thread:$0]  %s106_s0, 128, %s15_s7, [#allocation3]  }
   0xc   :  { %83 = dma.done.wait [#allocation3], 128  }
   0xd   :  { %84 = vsyncadd [#allocation3], 4294967168  ;;  %v21_v0 = vld [vmem:[#allocation2] sm:$0xff]  ;;  %s88_s11 = smov 1   ;;  %s89_s12 = smov [#allocation5]  }
   0xe   :  { %22 = vrot.lane.b32.xlu0 %v21_v0, %s88_s11  ;;  %s31_s13 = sshll.u32 %s89_s12, 4  ;;  %s32_s13 = int_to_ptr.vmem [resolvable:$true] %s31_s13 }
   0xf   :  { %s63_s14 = scalar_lea.vmem %s32_s13, 128  ;;  %p68_p6 = scmp.lt.s32.totalorder %s32_s13, %s32_s13 }
  0x10   :  { %p64_p5 = scmp.ne.s32.totalorder %s32_s13, %s63_s14  ;;  %p69_p7 = scmp.lt.s32.totalorder %s63_s14, %s63_s14 }
  0x12   :  { %p70_p8 = por %p69_p7, %p68_p6 }
  0x14   :  { %p71_p9 = pnand %p70_p8, %p64_p5 }
  0x80   :  { %v23_v1 = vpop.permute.xlu0 %22 }
  0x81   :  { %24 = vst [vmem:[#allocation5] sm:$0xff] %v23_v1 }
  0x82   :  { %74 = shalt.err (!%p71_p9)
}
  0x83   :  { %34 = dma.vmem_to_hbm [thread:$0]  %s32_s13, 128, %s107_s1, [#allocation4]  }
  0x84   :  { %85 = dma.done.wait [#allocation4], 128  }
  0x85   :  { %86 = vsyncadd [#allocation4], 4294967168 }
  0x86   :  { %38 = vsyncpa [#allocation3], 1 }
  0x87   :  { %39 = vsyncpa [#allocation4], 1 }

</bundles_post_ra>
